<compile_context>
chip_gen: v7x
topology: tpu7x:2x2x1
jax: 0.10.0
libtpu: 0.0.40
codegen_flags: <defaults>
</compile_context>

<pallas_src>
import functools

import jax
import jax.numpy as jnp
from jax import lax
from jax.experimental import pallas as pl
from jax.experimental.pallas import tpu as pltpu

BLOCK_SIZE = 8     # T (max sequence length)
N_EMBED = 32       # C
NUM_HEADS = 4
HEAD_SIZE = N_EMBED // NUM_HEADS   # 8, so concat over heads gives N_EMBED


def _multihead_kernel(x_ref, w_ref, bp_ref, o_ref, *, num_heads, stable_softmax):
    # x_ref:  (Bblk*T, C)        flattened batch chunk
    # w_ref:  (C, 2*C + H*C)     fused [Wq | Wk | Wvp_0 .. Wvp_{H-1}], (in, out) layout
    # bp_ref: (1, C)             projection bias
    # o_ref:  (Bblk, T, C)
    Bb, T, C = o_ref.shape
    hs = C // num_heads
    scale = C ** (-0.5)  # scales by n_embd, as in the PyTorch code

    x2 = x_ref[...].astype(jnp.float32)                       # (Bb*T, C), no reshape

    # One fused projection: Q, K and (V @ proj-slice) for all heads at once.
    qkv = jnp.dot(x2, w_ref[...].astype(jnp.float32),
                  preferred_element_type=jnp.float32)          # (Bb*T, 2C + H*C)

    # Causal (tril) mask, shared by all heads / batch elements.
    row = lax.broadcasted_iota(jnp.int32, (T, T), 0)
    col = lax.broadcasted_iota(jnp.int32, (T, T), 1)
    causal = (row >= col)[None]                                # (1, T, T)

    bias = bp_ref[...].astype(jnp.float32)                     # (1, C)
    # Bias broadcast hoisted out of the head loop; heads accumulate into acc,
    # so no concatenate and no separate output-projection matmuls are needed.
    acc = jnp.broadcast_to(bias[None], (Bb, T, C))

    for h in range(num_heads):                                 # static unroll, H=4
        lo = h * hs
        q = qkv[:, lo:lo + hs].reshape(Bb, T, hs)
        k = qkv[:, C + lo:C + lo + hs].reshape(Bb, T, hs)
        # V already multiplied by its slice of the output projection (host-folded).
        vp = qkv[:, 2 * C + h * C:2 * C + (h + 1) * C].reshape(Bb, T, C)

        wei = jnp.einsum('btd,bsd->bts', q, k,
                         preferred_element_type=jnp.float32) * scale   # (Bb, T, T)
        wei = jnp.where(causal, wei, -jnp.inf)
        if stable_softmax:
            # Only needed for unbounded logits; masked entries exp to 0 either way.
            wei = wei - wei.max(axis=-1, keepdims=True)
        e = jnp.exp(wei)
        s = e.sum(axis=-1, keepdims=True)
        r = pl.reciprocal(s, approx=True)      # EUP slot
        r = r * (2.0 - s * r)                  # one Newton step: rel err ~1e-7
        p = e * r

        acc = acc + jnp.einsum('bts,bsc->btc', p, vp,
                               preferred_element_type=jnp.float32)      # (Bb, T, C)

    o_ref[...] = acc.astype(o_ref.dtype)


def multihead_forward(x, wq, wk, wv, wp, bp, *, batch_block=None,
                      stable_softmax=False):
    """x: (B, T, C); wq/wk/wv: (H, hs, C) (PyTorch (out,in)); wp: (C, C); bp: (C,)."""
    B, T, C = x.shape
    H, hs, _ = wq.shape
    assert H * hs == C

    if batch_block is None:
        batch_block = B
        if B % 2 == 0 and B > 1:
            # >= 2 grid steps so the "parallel" axis can shard across v7x's 2 TCs.
            batch_block = B // 2
        # Keep M = batch_block*T moderate: bounds live f32 intermediates
        # (vreg pressure) and per-step VMEM (v7x: 64 MiB physical).
        max_rows = 512
        while batch_block * T > max_rows and batch_block % 2 == 0:
            batch_block //= 2
    assert B % batch_block == 0

    # ---- host-side weight prep (free in XLA) ----
    # Fused QKV in (in, out) layout; output projection folded into V per head:
    #   Wvp_h = wv[h].T @ wp.T[h*hs:(h+1)*hs, :]   (C x C)
    wq_t = wq.reshape(C, C).T                                   # (C, C)
    wk_t = wk.reshape(C, C).T                                   # (C, C)
    wp_t = wp.T                                                 # (C_in, C_out)
    wvp = jnp.concatenate(
        [wv[h].T @ wp_t[h * hs:(h + 1) * hs, :] for h in range(H)], axis=1)  # (C, H*C)
    w_packed = jnp.concatenate([wq_t, wk_t, wvp], axis=1)       # (C, 2C + H*C)
    bp2 = bp.reshape(1, C)

    # Flatten batch*seq in the wrapper (free XLA reshape) so the kernel never
    # reshapes the matmul input.
    x2 = x.reshape(B * T, C)

    kernel = functools.partial(_multihead_kernel, num_heads=H,
                               stable_softmax=stable_softmax)

    return pl.pallas_call(
        kernel,
        out_shape=jax.ShapeDtypeStruct((B, T, C), x.dtype),
        grid_spec=pltpu.PrefetchScalarGridSpec(
            num_scalar_prefetch=0,
            grid=(B // batch_block,),
            in_specs=[
                pl.BlockSpec((batch_block * T, C), lambda b: (b, 0)),
                pl.BlockSpec((C, 2 * C + H * C), lambda b: (0, 0)),
                pl.BlockSpec((1, C), lambda b: (0, 0)),
            ],
            out_specs=pl.BlockSpec((batch_block, T, C), lambda b: (b, 0, 0)),
        ),
        compiler_params=pltpu.CompilerParams(
            dimension_semantics=("parallel",),   # batch-chunk axis
        ),
    )(x2, w_packed, bp2)


def _reference(x, wq, wk, wv, wp, bp):
    """Pure-JAX reference mirroring the PyTorch forward (eval mode)."""
    B, T, C = x.shape
    H, hs, _ = wq.shape
    scale = C ** (-0.5)
    tril = jnp.tril(jnp.ones((T, T), dtype=bool))
    outs = []
    for h in range(H):
        q = x @ wq[h].T
        k = x @ wk[h].T
        v = x @ wv[h].T
        wei = (q @ jnp.swapaxes(k, -2, -1)) * scale
        wei = jnp.where(tril[None], wei, -jnp.inf)
        wei = jax.nn.softmax(wei, axis=-1)
        outs.append(wei @ v)
    cat = jnp.concatenate(outs, axis=-1)
    return cat @ wp.T + bp


if __name__ == "__main__":
    key = jax.random.PRNGKey(0)
    kx, kq, kk, kv, kp, kb = jax.random.split(key, 6)

    B, T, C, H, hs = 2, BLOCK_SIZE, N_EMBED, NUM_HEADS, HEAD_SIZE

    x = jax.random.normal(kx, (B, T, C), dtype=jnp.float32)
    # deterministic "Linear" weights (PyTorch layout: (out_features, in_features))
    wq = jax.random.normal(kq, (H, hs, C), dtype=jnp.float32) * 0.1
    wk = jax.random.normal(kk, (H, hs, C), dtype=jnp.float32) * 0.1
    wv = jax.random.normal(kv, (H, hs, C), dtype=jnp.float32) * 0.1
    wp = jax.random.normal(kp, (C, C), dtype=jnp.float32) * 0.1
    bp = jax.random.normal(kb, (C,), dtype=jnp.float32) * 0.1

    out = multihead_forward(x, wq, wk, wv, wp, bp)
    out = jax.block_until_ready(out)

    ref = _reference(x, wq, wk, wv, wp, bp)
    assert out.shape == (B, T, C)
    assert jnp.allclose(out, ref, atol=1e-4, rtol=1e-4)

    print("KERNEL_OK")
</pallas_src>

<mosaic_0001>
module attributes {stable_mosaic.version = 11 : i64} {
  func.func @_multihead_kernel(%arg0: i32, %arg1: memref<8x32xf32, #tpu.memory_space<vmem>>, %arg2: memref<32x192xf32, #tpu.memory_space<vmem>>, %arg3: memref<1x32xf32, #tpu.memory_space<vmem>>, %arg4: memref<1x8x32xf32, #tpu.memory_space<vmem>>) attributes {dimension_semantics = [#tpu.dimension_semantics<parallel>], iteration_bounds = array<i64: 2>, scalar_prefetch = 0 : i64, scratch_operands = 0 : i64, tpu.core_type = #tpu.core_type<tc>, window_params = [{transform_indices = @transform_0, window_bounds = array<i64: 8, 32>}, {pipeline_mode = #tpu.pipeline_mode<synchronous>, transform_indices = @transform_1, window_bounds = array<i64: 32, 192>}, {pipeline_mode = #tpu.pipeline_mode<synchronous>, transform_indices = @transform_2, window_bounds = array<i64: 1, 32>}, {transform_indices = @transform_3, window_bounds = array<i64: 1, 8, 32>}]} {
    %c0 = arith.constant 0 : index
    %c0_0 = arith.constant 0 : index
    %0 = vector.load %arg1[%c0, %c0_0] : memref<8x32xf32, #tpu.memory_space<vmem>>, vector<8x32xf32>
    %c0_1 = arith.constant 0 : index
    %c0_2 = arith.constant 0 : index
    %1 = vector.load %arg2[%c0_1, %c0_2] : memref<32x192xf32, #tpu.memory_space<vmem>>, vector<32x192xf32>
    %cst = arith.constant dense<0.000000e+00> : vector<8x192xf32>
    %2 = tpu.matmul %0, %1, %cst {dimension_numbers = #tpu.dot_dimension_numbers<[1], [0], [0], [1], [0, 0, 1, 1], [], []>} : vector<8x32xf32>, vector<32x192xf32>, vector<8x192xf32> -> vector<8x192xf32>
    %3 = tpu.iota {dimensions = array<i32: 0>} : vector<8x8xi32>
    %4 = tpu.iota {dimensions = array<i32: 1>} : vector<8x8xi32>
    %5 = arith.cmpi sge, %3, %4 : vector<8x8xi32>
    %6 = vector.shape_cast %5 : vector<8x8xi1> to vector<1x8x8xi1>
    %c0_3 = arith.constant 0 : index
    %c0_4 = arith.constant 0 : index
    %7 = vector.load %arg3[%c0_3, %c0_4] : memref<1x32xf32, #tpu.memory_space<vmem>>, vector<1x32xf32>
    %8 = vector.shape_cast %7 : vector<1x32xf32> to vector<1x1x32xf32>
    %9 = vector.shape_cast %8 : vector<1x1x32xf32> to vector<1x1x32xf32>
    %10 = vector.broadcast %9 : vector<1x1x32xf32> to vector<1x8x32xf32>
    %11 = vector.extract_strided_slice %2 {offsets = [0, 0], sizes = [8, 8], strides = [1, 1]} : vector<8x192xf32> to vector<8x8xf32>
    %12 = vector.shape_cast %11 : vector<8x8xf32> to vector<1x8x8xf32>
    %13 = vector.extract_strided_slice %2 {offsets = [0, 32], sizes = [8, 8], strides = [1, 1]} : vector<8x192xf32> to vector<8x8xf32>
    %14 = vector.shape_cast %13 : vector<8x8xf32> to vector<1x8x8xf32>
    %15 = vector.extract_strided_slice %2 {offsets = [0, 64], sizes = [8, 32], strides = [1, 1]} : vector<8x192xf32> to vector<8x32xf32>
    %16 = vector.shape_cast %15 : vector<8x32xf32> to vector<1x8x32xf32>
    "tpu.trace_start"() <{level = 10 : i32, message = "btd,bsd->bts"}> : () -> ()
    %cst_5 = arith.constant dense<0.000000e+00> : vector<1x8x8xf32>
    %17 = tpu.matmul %12, %14, %cst_5 {dimension_numbers = #tpu.dot_dimension_numbers<[2], [2], [1], [1], [0, 0, 0, 1, 1, 1], [0], [0]>} : vector<1x8x8xf32>, vector<1x8x8xf32>, vector<1x8x8xf32> -> vector<1x8x8xf32>
    "tpu.trace_stop"() : () -> ()
    %cst_6 = arith.constant 0.176776692 : f32
    %18 = vector.broadcast %cst_6 : f32 to vector<1x8x8xf32>
    %19 = arith.mulf %17, %18 : vector<1x8x8xf32>
    %cst_7 = arith.constant 0xFF800000 : f32
    %20 = vector.broadcast %cst_7 : f32 to vector<1x8x8xf32>
    %21 = arith.select %6, %19, %20 : vector<1x8x8xi1>, vector<1x8x8xf32>
    %22 = math.exp %21 : vector<1x8x8xf32>
    %cst_8 = arith.constant dense<0.000000e+00> : vector<1x8xf32>
    %23 = vector.multi_reduction <add>, %22, %cst_8 [2] : vector<1x8x8xf32> to vector<1x8xf32>
    %24 = vector.shape_cast %23 : vector<1x8xf32> to vector<1x8x1xf32>
    %25 = tpu.reciprocal %24 {approx = true} : vector<1x8x1xf32> -> vector<1x8x1xf32>
    %26 = arith.mulf %24, %25 : vector<1x8x1xf32>
    %cst_9 = arith.constant 2.000000e+00 : f32
    %27 = vector.broadcast %cst_9 : f32 to vector<1x8x1xf32>
    %28 = arith.subf %27, %26 : vector<1x8x1xf32>
    %29 = arith.mulf %25, %28 : vector<1x8x1xf32>
    %30 = vector.broadcast %29 : vector<1x8x1xf32> to vector<1x8x8xf32>
    %31 = arith.mulf %22, %30 : vector<1x8x8xf32>
    "tpu.trace_start"() <{level = 10 : i32, message = "bts,bsc->btc"}> : () -> ()
    %cst_10 = arith.constant dense<0.000000e+00> : vector<1x8x32xf32>
    %32 = tpu.matmul %31, %16, %cst_10 {dimension_numbers = #tpu.dot_dimension_numbers<[2], [1], [1], [2], [0, 0, 0, 1, 1, 2], [0], [0]>} : vector<1x8x8xf32>, vector<1x8x32xf32>, vector<1x8x32xf32> -> vector<1x8x32xf32>
    "tpu.trace_stop"() : () -> ()
    %33 = arith.addf %10, %32 : vector<1x8x32xf32>
    %34 = vector.extract_strided_slice %2 {offsets = [0, 8], sizes = [8, 8], strides = [1, 1]} : vector<8x192xf32> to vector<8x8xf32>
    %35 = vector.shape_cast %34 : vector<8x8xf32> to vector<1x8x8xf32>
    %36 = vector.extract_strided_slice %2 {offsets = [0, 40], sizes = [8, 8], strides = [1, 1]} : vector<8x192xf32> to vector<8x8xf32>
    %37 = vector.shape_cast %36 : vector<8x8xf32> to vector<1x8x8xf32>
    %38 = vector.extract_strided_slice %2 {offsets = [0, 96], sizes = [8, 32], strides = [1, 1]} : vector<8x192xf32> to vector<8x32xf32>
    %39 = vector.shape_cast %38 : vector<8x32xf32> to vector<1x8x32xf32>
    "tpu.trace_start"() <{level = 10 : i32, message = "btd,bsd->bts"}> : () -> ()
    %cst_11 = arith.constant dense<0.000000e+00> : vector<1x8x8xf32>
    %40 = tpu.matmul %35, %37, %cst_11 {dimension_numbers = #tpu.dot_dimension_numbers<[2], [2], [1], [1], [0, 0, 0, 1, 1, 1], [0], [0]>} : vector<1x8x8xf32>, vector<1x8x8xf32>, vector<1x8x8xf32> -> vector<1x8x8xf32>
    "tpu.trace_stop"() : () -> ()
    %cst_12 = arith.constant 0.176776692 : f32
    %41 = vector.broadcast %cst_12 : f32 to vector<1x8x8xf32>
    %42 = arith.mulf %40, %41 : vector<1x8x8xf32>
    %cst_13 = arith.constant 0xFF800000 : f32
    %43 = vector.broadcast %cst_13 : f32 to vector<1x8x8xf32>
    %44 = arith.select %6, %42, %43 : vector<1x8x8xi1>, vector<1x8x8xf32>
    %45 = math.exp %44 : vector<1x8x8xf32>
    %cst_14 = arith.constant dense<0.000000e+00> : vector<1x8xf32>
    %46 = vector.multi_reduction <add>, %45, %cst_14 [2] : vector<1x8x8xf32> to vector<1x8xf32>
    %47 = vector.shape_cast %46 : vector<1x8xf32> to vector<1x8x1xf32>
    %48 = tpu.reciprocal %47 {approx = true} : vector<1x8x1xf32> -> vector<1x8x1xf32>
    %49 = arith.mulf %47, %48 : vector<1x8x1xf32>
    %cst_15 = arith.constant 2.000000e+00 : f32
    %50 = vector.broadcast %cst_15 : f32 to vector<1x8x1xf32>
    %51 = arith.subf %50, %49 : vector<1x8x1xf32>
    %52 = arith.mulf %48, %51 : vector<1x8x1xf32>
    %53 = vector.broadcast %52 : vector<1x8x1xf32> to vector<1x8x8xf32>
    %54 = arith.mulf %45, %53 : vector<1x8x8xf32>
    "tpu.trace_start"() <{level = 10 : i32, message = "bts,bsc->btc"}> : () -> ()
    %cst_16 = arith.constant dense<0.000000e+00> : vector<1x8x32xf32>
    %55 = tpu.matmul %54, %39, %cst_16 {dimension_numbers = #tpu.dot_dimension_numbers<[2], [1], [1], [2], [0, 0, 0, 1, 1, 2], [0], [0]>} : vector<1x8x8xf32>, vector<1x8x32xf32>, vector<1x8x32xf32> -> vector<1x8x32xf32>
    "tpu.trace_stop"() : () -> ()
    %56 = arith.addf %33, %55 : vector<1x8x32xf32>
    %57 = vector.extract_strided_slice %2 {offsets = [0, 16], sizes = [8, 8], strides = [1, 1]} : vector<8x192xf32> to vector<8x8xf32>
    %58 = vector.shape_cast %57 : vector<8x8xf32> to vector<1x8x8xf32>
    %59 = vector.extract_strided_slice %2 {offsets = [0, 48], sizes = [8, 8], strides = [1, 1]} : vector<8x192xf32> to vector<8x8xf32>
    %60 = vector.shape_cast %59 : vector<8x8xf32> to vector<1x8x8xf32>
    %61 = vector.extract_strided_slice %2 {offsets = [0, 128], sizes = [8, 32], strides = [1, 1]} : vector<8x192xf32> to vector<8x32xf32>
    %62 = vector.shape_cast %61 : vector<8x32xf32> to vector<1x8x32xf32>
    "tpu.trace_start"() <{level = 10 : i32, message = "btd,bsd->bts"}> : () -> ()
    %cst_17 = arith.constant dense<0.000000e+00> : vector<1x8x8xf32>
    %63 = tpu.matmul %58, %60, %cst_17 {dimension_numbers = #tpu.dot_dimension_numbers<[2], [2], [1], [1], [0, 0, 0, 1, 1, 1], [0], [0]>} : vector<1x8x8xf32>, vector<1x8x8xf32>, vector<1x8x8xf32> -> vector<1x8x8xf32>
    "tpu.trace_stop"() : () -> ()
    %cst_18 = arith.constant 0.176776692 : f32
    %64 = vector.broadcast %cst_18 : f32 to vector<1x8x8xf32>
    %65 = arith.mulf %63, %64 : vector<1x8x8xf32>
    %cst_19 = arith.constant 0xFF800000 : f32
    %66 = vector.broadcast %cst_19 : f32 to vector<1x8x8xf32>
    %67 = arith.select %6, %65, %66 : vector<1x8x8xi1>, vector<1x8x8xf32>
    %68 = math.exp %67 : vector<1x8x8xf32>
    %cst_20 = arith.constant dense<0.000000e+00> : vector<1x8xf32>
    %69 = vector.multi_reduction <add>, %68, %cst_20 [2] : vector<1x8x8xf32> to vector<1x8xf32>
    %70 = vector.shape_cast %69 : vector<1x8xf32> to vector<1x8x1xf32>
    %71 = tpu.reciprocal %70 {approx = true} : vector<1x8x1xf32> -> vector<1x8x1xf32>
    %72 = arith.mulf %70, %71 : vector<1x8x1xf32>
    %cst_21 = arith.constant 2.000000e+00 : f32
    %73 = vector.broadcast %cst_21 : f32 to vector<1x8x1xf32>
    %74 = arith.subf %73, %72 : vector<1x8x1xf32>
    %75 = arith.mulf %71, %74 : vector<1x8x1xf32>
    %76 = vector.broadcast %75 : vector<1x8x1xf32> to vector<1x8x8xf32>
    %77 = arith.mulf %68, %76 : vector<1x8x8xf32>
    "tpu.trace_start"() <{level = 10 : i32, message = "bts,bsc->btc"}> : () -> ()
    %cst_22 = arith.constant dense<0.000000e+00> : vector<1x8x32xf32>
    %78 = tpu.matmul %77, %62, %cst_22 {dimension_numbers = #tpu.dot_dimension_numbers<[2], [1], [1], [2], [0, 0, 0, 1, 1, 2], [0], [0]>} : vector<1x8x8xf32>, vector<1x8x32xf32>, vector<1x8x32xf32> -> vector<1x8x32xf32>
    "tpu.trace_stop"() : () -> ()
    %79 = arith.addf %56, %78 : vector<1x8x32xf32>
    %80 = vector.extract_strided_slice %2 {offsets = [0, 24], sizes = [8, 8], strides = [1, 1]} : vector<8x192xf32> to vector<8x8xf32>
    %81 = vector.shape_cast %80 : vector<8x8xf32> to vector<1x8x8xf32>
    %82 = vector.extract_strided_slice %2 {offsets = [0, 56], sizes = [8, 8], strides = [1, 1]} : vector<8x192xf32> to vector<8x8xf32>
    %83 = vector.shape_cast %82 : vector<8x8xf32> to vector<1x8x8xf32>
    %84 = vector.extract_strided_slice %2 {offsets = [0, 160], sizes = [8, 32], strides = [1, 1]} : vector<8x192xf32> to vector<8x32xf32>
    %85 = vector.shape_cast %84 : vector<8x32xf32> to vector<1x8x32xf32>
    "tpu.trace_start"() <{level = 10 : i32, message = "btd,bsd->bts"}> : () -> ()
    %cst_23 = arith.constant dense<0.000000e+00> : vector<1x8x8xf32>
    %86 = tpu.matmul %81, %83, %cst_23 {dimension_numbers = #tpu.dot_dimension_numbers<[2], [2], [1], [1], [0, 0, 0, 1, 1, 1], [0], [0]>} : vector<1x8x8xf32>, vector<1x8x8xf32>, vector<1x8x8xf32> -> vector<1x8x8xf32>
    "tpu.trace_stop"() : () -> ()
    %cst_24 = arith.constant 0.176776692 : f32
    %87 = vector.broadcast %cst_24 : f32 to vector<1x8x8xf32>
    %88 = arith.mulf %86, %87 : vector<1x8x8xf32>
    %cst_25 = arith.constant 0xFF800000 : f32
    %89 = vector.broadcast %cst_25 : f32 to vector<1x8x8xf32>
    %90 = arith.select %6, %88, %89 : vector<1x8x8xi1>, vector<1x8x8xf32>
    %91 = math.exp %90 : vector<1x8x8xf32>
    %cst_26 = arith.constant dense<0.000000e+00> : vector<1x8xf32>
    %92 = vector.multi_reduction <add>, %91, %cst_26 [2] : vector<1x8x8xf32> to vector<1x8xf32>
    %93 = vector.shape_cast %92 : vector<1x8xf32> to vector<1x8x1xf32>
    %94 = tpu.reciprocal %93 {approx = true} : vector<1x8x1xf32> -> vector<1x8x1xf32>
    %95 = arith.mulf %93, %94 : vector<1x8x1xf32>
    %cst_27 = arith.constant 2.000000e+00 : f32
    %96 = vector.broadcast %cst_27 : f32 to vector<1x8x1xf32>
    %97 = arith.subf %96, %95 : vector<1x8x1xf32>
    %98 = arith.mulf %94, %97 : vector<1x8x1xf32>
    %99 = vector.broadcast %98 : vector<1x8x1xf32> to vector<1x8x8xf32>
    %100 = arith.mulf %91, %99 : vector<1x8x8xf32>
    "tpu.trace_start"() <{level = 10 : i32, message = "bts,bsc->btc"}> : () -> ()
    %cst_28 = arith.constant dense<0.000000e+00> : vector<1x8x32xf32>
    %101 = tpu.matmul %100, %85, %cst_28 {dimension_numbers = #tpu.dot_dimension_numbers<[2], [1], [1], [2], [0, 0, 0, 1, 1, 2], [0], [0]>} : vector<1x8x8xf32>, vector<1x8x32xf32>, vector<1x8x32xf32> -> vector<1x8x32xf32>
    "tpu.trace_stop"() : () -> ()
    %102 = arith.addf %79, %101 : vector<1x8x32xf32>
    %c0_29 = arith.constant 0 : index
    %c0_30 = arith.constant 0 : index
    %c0_31 = arith.constant 0 : index
    %103 = vector.load %arg4[%c0_29, %c0_30, %c0_31] : memref<1x8x32xf32, #tpu.memory_space<vmem>>, vector<1x8x32xf32>
    tpu.vector_store %arg4[%c0_29, %c0_30, %c0_31], %102 {strides = array<i32>} : memref<1x8x32xf32, #tpu.memory_space<vmem>>, vector<1x8x32xf32>,
    return
  }
  func.func @transform_0(%arg0: i32) -> (i32, i32) {
    %c0_i32 = arith.constant 0 : i32
    %c0_i32_0 = arith.constant 0 : i32
    return %arg0, %c0_i32 : i32, i32
  }
  func.func @transform_1(%arg0: i32) -> (i32, i32) {
    %c0_i32 = arith.constant 0 : i32
    %c0_i32_0 = arith.constant 0 : i32
    %c0_i32_1 = arith.constant 0 : i32
    return %c0_i32, %c0_i32_0 : i32, i32
  }
  func.func @transform_2(%arg0: i32) -> (i32, i32) {
    %c0_i32 = arith.constant 0 : i32
    %c0_i32_0 = arith.constant 0 : i32
    %c0_i32_1 = arith.constant 0 : i32
    return %c0_i32, %c0_i32_0 : i32, i32
  }
  func.func @transform_3(%arg0: i32) -> (i32, i32, i32) {
    %c0_i32 = arith.constant 0 : i32
    %c0_i32_0 = arith.constant 0 : i32
    %c0_i32_1 = arith.constant 0 : i32
    return %arg0, %c0_i32, %c0_i32_0 : i32, i32, i32
  }
}

</mosaic_0001>

<bundles_post_ra>
// kernel: tpu_custom_call.1
= control target key start
LH: loop header
LB: loop body
LE: loop exit
PB: predicated region body
PF: predicated region fallthrough
CT: control target
= control target key end

     0   :  { %8 = vsyncpa [#allocation3], 0  ;;  %s1677_s0 = inlined_call_operand.hbm [shape: f32[16,32], index: 0, kind: input, shape index: {}]   ;;  %s1678_s1 = inlined_call_operand.hbm [shape: f32[32,192], index: 1, kind: input, shape index: {}]   ;;  %s1679_s2 = inlined_call_operand.vmem [shape: f32[1,32], index: 2, kind: input, shape index: {}]   ;;  %s1680_s3 = inlined_call_operand.hbm [shape: f32[2,8,32], index: 3, kind: output, shape index: {}]  }
   0x1   :  { %10 = vsyncpa [#allocation3 + $0x1], 0 }
   0x2   :  { %11 = vsyncpa [#allocation6], 0 }
   0x3   :  { %12 = vsyncpa [#allocation4], 0 }
   0x4   :  { %14 = vsyncpa [#allocation4 + $0x1], 0  ;;  %s1409_s12 = smov 0   ;;  %s1411_s13 = smov 0  }
   0x5   :  { %s1413_s14 = smov 0   ;;  %s1415_s15 = smov 0  }
   0x6 LB: > { %s1430_s16 = sadd.s32 4294967295, %s1371_s15   ;;  %s1058_s17 = sadd.s32 4294967294, %s1371_s15   ;;  %s1371_s15 = sphi %s1415_s15, %s1700_s15   ;;  %s1367_s14 = sphi %s1413_s14, %s1699_s14   ;;  %s1363_s13 = sphi %s1411_s13, %s1698_s13   ;;  %s1359_s12 = sphi %s1409_s12, %s1697_s12  }
   0x7   : > { %p40_p0 = scmp.ne.s32.totalorder %s1363_s13, %s1359_s12  ;;  %p1681_p1 = scmp.eq.s32.totalorder %s1430_s16, 0 }
   0x8   : > { %p112_p3 = scmp.eq.s32.totalorder %s1058_s17, 1  ;;  %p1059_p5 = scmp.ge.s32.totalorder %s1371_s15, 1 }
   0x9   : > { %p1439_p4 = por %p1681_p1, %p40_p0  ;;  %p119_p7 = scmp.lt.s32.totalorder %s1371_s15, 3 }
   0xa   : > { %p1444_p6 = por %p112_p3, %p40_p0  ;;  %s1373_s21 = smov [#allocation5]  }
   0xb   : > { %s1684_s18 = scalar_select %p1439_p4, 1, 0 }
   0xc   : > { %s1685_s19 = scalar_select %p1444_p6, 1, 0 }
   0xd   : > { %p1449_p8 = pnand %p1059_p5, %p119_p7  ;;  %s131_s22 = sshll.u32 %s1373_s21, 4  ;;  %s1453_s22 = int_to_ptr.vmem [resolvable:$true] %s131_s22 }
   0xe   : > { %s1465_s24 = sadd.s32 1, %s1371_s15   ;;  %s27_s25 = sadd.s32 1, %s1367_s14 }
   0xf   : > { %s1686_s20 = scalar_select %p1449_p8, 1, 0 }
  0x10   : > { %p1165_p9 = pneg %p1449_p8  ;;  %s24_s26 = ssub.s32 %s1371_s15, %s1465_s24 }
  0x11   : > { %s1243_s29 = scalar_lea.hbm %s1678_s1, 1024 }
  0x12   : > { %p1460_p11 = pnand %p1165_p9, %p1681_p1  ;;  %p1244_p12 = scmp.ne.s32.totalorder %s1678_s1, %s1243_s29 }
  0x13   : > { %p1250_p5 = scmp.lt.u32.totalorder %s1243_s29, %s1678_s1 }
  0x14   : > { %p1245_p13 = pneg %p1460_p11 }
  0x16   : > { %p1246_p0 = pnand %p1245_p13, %p1244_p12 }
  0x18   : > { %p1247_p3 = pneg %p1246_p0 }
  0x1a   : > { %p1252_p7 = pnand %p1250_p5, %p1247_p3 }
  0x1c   : > { %1255 = shalt.err (!%p1252_p7)
}
  0x1d   : > { %s1256_s7 = scalar_lea.vmem %s1453_s22, 1024  ;;  %p1264_p2 = scmp.lt.s32.totalorder %s1453_s22, %s1453_s22 }
  0x1e   : > { %p1257_p9 = scmp.ne.s32.totalorder %s1453_s22, %s1256_s7  ;;  %p1265_p6 = scmp.lt.s32.totalorder %s1256_s7, %s1256_s7 }
  0x20   : > { %p1259_p10 = pnand %p1257_p9, %p1245_p13  ;;  %p1266_p4 = por %p1265_p6, %p1264_p2 }
  0x22   : > { %p1260_p1 = pneg %p1259_p10 }
  0x24   : > { %p1267_p8 = pnand %p1266_p4, %p1260_p1 }
  0x26   : > { %1270 = shalt.err (!%p1267_p8)
}
  0x27   : > { %s1374_s8 = smov 256   ;;  %s1375_s9 = smov 16  }
  0x28   : > { %1168 = dma.hbm_to_vmem [thread:$0]  (!%p1460_p11), %s1678_s1, 1024, %s1453_s22, [#allocation6], %s1374_s8, %s1374_s8, %s1375_s9  }
  0x29   : > { %p25_p2 = scmp.eq.s32.totalorder %s24_s26, 0  ;;  %p34_p1 = scmp.ne.s32.totalorder %s1367_s14, %s1363_s13 }
  0x2a   : > { %p35_p4 = scmp.eq.s32.totalorder %s1371_s15, 0  ;;  %p1178_p6 = scmp.lt.s32.totalorder %s1371_s15, 2 }
  0x2b   : > { %s1496_s17 = scalar_select %p25_p2, %s1367_s14, %s27_s25  }
  0x2c   : > { %p36_p8 = por %p35_p4, %p34_p1  ;;  %p1688_p10 = scmp.eq.s32.totalorder %s1430_s16, 1 }
  0x2d   : > { %s148_s27 = sand.u32 1, %s1367_s14   ;;  %s1063_s28 = sshll.u32 %s1371_s15, 7 }
  0x2e   : > { %p1500_p12 = por %p1688_p10, %p34_p1  ;;  %s1062_s29 = sshll.u32 %s148_s27, 3 }
  0x2f   : > { %s1509_s4 = scalar_lea.hbm %s1677_s0, %s1063_s28  ;;  %s152_s22 = scalar_lea.vmem [#allocation2], %s1062_s29 }
  0x30   : > { %s159_s25 = sshll.u32 %s152_s22, 4  ;;  %p1511_p11 = pnand %p1178_p6, %p36_p8  ;;  %s1515_s25 = int_to_ptr.vmem [resolvable:$true] %s159_s25 }
  0x31   : > { %s149_s5 = scalar_lea.sflag [#allocation3], %s148_s27  ;;  %s1271_s6 = scalar_lea.hbm %s1509_s4, 128 }
  0x32   : > { %p1272_p13 = scmp.ne.s32.totalorder %s1509_s4, %s1271_s6  ;;  %p1273_p0 = pneg %p1511_p11 }
  0x33   : > { %s1276_s9 = scalar_lea.hbm %s1677_s0, 256  ;;  %p1277_p7 = scmp.lt.u32.totalorder %s1509_s4, %s1677_s0 }
  0x34   : > { %p1274_p3 = pnand %p1273_p0, %p1272_p13  ;;  %p1278_p9 = scmp.lt.u32.totalorder %s1276_s9, %s1271_s6 }
  0x35   : > { %p1280_p1 = scmp.lt.u32.totalorder %s1271_s6, %s1509_s4 }
  0x36   : > { %p1275_p5 = pneg %p1274_p3  ;;  %p1279_p2 = por %p1278_p9, %p1277_p7 }
  0x38   : > { %p1281_p4 = por %p1280_p1, %p1279_p2 }
  0x3a   : > { %p1282_p6 = pnand %p1281_p4, %p1275_p5 }
  0x3c   : > { %1285 = shalt.err (!%p1282_p6)
}
  0x3d   : > { %s1286_s27 = scalar_lea.vmem %s1515_s25, 128  ;;  %s1376_s28 = smov [#allocation2]  }
  0x3e   : > { %p1287_p8 = scmp.ne.s32.totalorder %s1515_s25, %s1286_s27  ;;  %s1291_s29 = sshll.u32 %s1376_s28, 4  ;;  %s1292_s29 = int_to_ptr.vmem [resolvable:$false] %s1291_s29 }
  0x3f   : > { %s1293_s23 = scalar_lea.vmem %s1292_s29, 256  ;;  %p1294_p3 = scmp.lt.s32.totalorder %s1515_s25, %s1292_s29 }
  0x40   : > { %p1289_p10 = pnand %p1287_p8, %p1273_p0  ;;  %p1295_p7 = scmp.lt.s32.totalorder %s1293_s23, %s1286_s27 }
  0x42   : > { %p1290_p13 = pneg %p1289_p10  ;;  %p1296_p9 = por %p1295_p7, %p1294_p3 }
  0x44   : > { %p1297_p2 = pnand %p1296_p9, %p1290_p13 }
  0x46   : > { %1300 = shalt.err (!%p1297_p2)
}
  0x47   : > { %1172 = dma.hbm_to_vmem [thread:$0]  (!%p1511_p11), %s1509_s4, 128, %s1515_s25, %s149_s5  }
  0x48   : > { %p1691_p5 = scmp.ne.s32.totalorder %s1686_s20, 0 }
  0x49   : > { %s1545_s30 = sand.u32 (!%p1691_p5), 1, %s1363_s13   ;;  %p1692_p0 = scmp.ne.s32.totalorder (!%p1691_p5), %s1684_s18, 0 }
  0x4a   : > { %168 = sbr.rel (%p1691_p5) target bundleno = 1097 (0x449), region = 32  ;;  %s1065_s22 = sshll.u32 (!%p1691_p5), %s1545_s30, 3 }
  0x4b   : > { %s171_s6 = scalar_lea.sflag (!%p1691_p5), [#allocation3], %s1545_s30  ;;  %s174_s7 = scalar_lea.vmem (!%p1691_p5), [#allocation2], %s1065_s22 }
  0x51   : > { %1346 = dma.done.wait (%p1692_p0), %s171_s6, 128  }
  0x52   : > { %1348 = vsyncadd (%p1692_p0), %s171_s6, 4294967168  ;;  %p1693_p11 = scmp.eq.s32.totalorder %s1430_s16, 0 }
  0x54   : > { %1350 = dma.done.wait (%p1693_p11), [#allocation6], 1024   ;;  %p1694_p1 = pmov %p1693_p11 }
  0x55   : > { %v1377_v0 = vmov 0.0   ;;  %v203_v1 = vld [vmem:[#allocation5 + $0x8] sm:$0xff]  ;;  %v205_v2 = vld [vmem:[#allocation5 + $0x18] sm:$0xff]  ;;  %v202_v3 = vld [vmem:[#allocation5] sm:$0xff]  ;;  %vm210_vm0 = vcmask 261120   ;;  %vm1378_vm1 = vmmov 0   ;;  %v285_v23 = vlaneseq }
  0x56   : > { %1352 = vsyncadd (%p1694_p1), [#allocation6], 4294966272  ;;  %278 = vmatprep.mubr.f32.mxu0 %v1377_v0  ;;  %1102 = vmatprep.subr.mxu1 %v1377_v0  ;;  %v1142_v4 = vpack.c.bf16 %v205_v2, %v203_v1  ;;  %v204_v5 = vld [vmem:[#allocation5 + $0x10] sm:$0xff]  ;;  %v207_v6 = vld [vmem:[#allocation5 + $0x28] sm:$0xff]  ;;  %s1379_s18 = smov 120   ;;  %s1380_s20 = smov 96  }
  0x57   : > { %v209_v7 = vld [vmem:[#allocation5 + $0x38] sm:$0xff]  ;;  %v1144_v8 = vpack.c.bf16 %v204_v5, %v202_v3  ;;  %v206_v10 = vld [vmem:[#allocation5 + $0x20] sm:$0xff]  ;;  %v208_v11 = vld [vmem:[#allocation5 + $0x30] sm:$0xff]  ;;  %1104 = vmatprep.mubr.msk.f32.mxu1 %vm1378_vm1, %v1377_v0  ;;  %s1381_s4 = smov 80   ;;  %s1382_s25 = smov 88   ;;  %vm300_vm2 = vcmask 64512  }
  0x58   : > { %v1146_v9 = vpack.c.bf16 %v209_v7, %v207_v6  ;;  %1143 = vmatprep.subr.bf16.mxu0 %v1142_v4  ;;  %v1148_v12 = vpack.c.bf16 %v208_v11, %v206_v10  ;;  %v201_v13 = vld [vmem:[%s174_s7] sm:$0xff]  ;;  %s1383_s26 = smov 72   ;;  %s1384_s5 = smov 112   ;;  %v286_v24 = vshrl.u32 %v285_v23, 7  ;;  %v288_v25 = vand.u32 127, %v285_v23 }
  0x59   : > { %1145 = vmatpush1.bf16.msra.mxu0 %v1144_v8  ;;  %s1385_s8 = smov 104   ;;  %s1386_s9 = smov 32  }
  0x5a   : > { %1147 = vmatprep.subr.bf16.mxu0 %v1146_v9  ;;  %vm289_vm3 = vcmp.ge.s32.totalorder %v286_v24, %v288_v25  ;;  %s1387_s10 = smov 64   ;;  %s1083_s28 = sshll.u32 %s1430_s16, 7 }
  0x5b   : > { %s200_s29 = scalar_lea.vmem [#allocation7], %s1065_s22  ;;  %s1388_s22 = smov [#allocation7]  }
  0x5c   : > { %s978_s23 = sshll.u32 %s200_s29, 4  ;;  %s1634_s23 = int_to_ptr.vmem [resolvable:$true] %s978_s23 }
  0x5d   : > { %1149 = vmatpush1.bf16.msra.mxu0 %v1148_v12  ;;  %s1301_s16 = scalar_lea.vmem %s1634_s23, 128 }
  0x5e   : > { %1112 = vmatprep.subr.mxu0 %v1377_v0  ;;  %p1302_p4 = scmp.ne.s32.totalorder %s1634_s23, %s1301_s16 }
  0x60   : > { %1068 = vmatmul.mubr.msk.f32.vlgmr.msra.gmra.mrb[0].mxu0 %vm210_vm0, %v201_v13  ;;  %p1303_p6 = pnand %p1302_p4, %p1500_p12 }
  0x61   : > { %1114 = vmatprep.mubr.msk.f32.mxu0 %vm1378_vm1, %v1377_v0 }
  0x62   : > { %p1304_p8 = pneg %p1303_p6 }
 0x133   : > { %v1567_v14 = vpop.f32.mrb[0].mxu0 }
 0x134   : > { %464 = vrot.lane.b32.xlu1 %v1567_v14, %s1379_s18  ;;  %298 = vrot.lane.b32.xlu0 %v1567_v14, %s1380_s20  ;;  %v1572_v15 = vpop.f32.mrb[1].mxu0  ;;  %s1632_s18 = scalar_lea.hbm %s1680_s3, %s1083_s28 }
 0x138   : > { %633 = vrot.lane.b32.xlu1 %v1567_v14, %s1381_s4  ;;  %466 = vrot.lane.b32.xlu0 %v1567_v14, %s1382_s25  ;;  %s1305_s4 = sshll.u32 %s1388_s22, 4  ;;  %s1306_s4 = int_to_ptr.vmem [resolvable:$false] %s1305_s4 }
 0x139   : > { %s1307_s25 = scalar_lea.vmem %s1306_s4, 256  ;;  %p1308_p10 = scmp.lt.s32.totalorder %s1634_s23, %s1306_s4 }
 0x13a   : > { %p1309_p13 = scmp.lt.s32.totalorder %s1307_s25, %s1301_s16 }
 0x13c   : > { %797 = vrot.lane.b32.xlu1 %v1567_v14, %s1383_s26  ;;  %631 = vrot.lane.b32.xlu0 %v1567_v14, %s1384_s5  ;;  %p1310_p3 = por %p1309_p13, %p1308_p10 }
 0x13e   : > { %p1311_p7 = pnand %p1310_p3, %p1304_p8 }
 0x140   : > { %795 = vrot.lane.b32.xlu0 %v1567_v14, %s1385_s8 }
 0x1a6   : > { %v465_v16 = vpop.permute.xlu1 %464  ;;  %v299_v17 = vpop.permute.xlu0 %298 }
 0x1a7   : > { %1103 = vmatpush3.xpose.msk.msra.mxu1 %vm300_vm2, %v299_v17 }
 0x1a8   : > { %1107 = vmatprep.subr.mxu1 %v1377_v0 }
 0x1aa   : > { %1105 = vmatmul.mubr.msk.f32.vlgmr.msra.gmra.mrb[0].mxu1 %vm300_vm2, %v1567_v14  ;;  %v467_v18 = vpop.permute.xlu0 %466  ;;  %v634_v19 = vpop.permute.xlu1 %633 }
 0x1ab   : > { %1113 = vmatpush3.xpose.msk.msra.mxu0 %vm300_vm2, %v467_v18  ;;  %1109 = vmatprep.mubr.msk.f32.mxu1 %vm1378_vm1, %v1377_v0  ;;  %v1069_v18 = vld [vmem:[%s1679_s2] ss:$0 sm:$0xff] }
 0x1ac   : > { %1122 = vmatprep.subr.mxu0 %v1377_v0 }
 0x1ae   : > { %1115 = vmatmul.mubr.msk.f32.vlgmr.msra.gmra.mrb[2].mxu0 %vm300_vm2, %v465_v16  ;;  %v632_v20 = vpop.permute.xlu0 %631  ;;  %v798_v21 = vpop.permute.xlu1 %797 }
 0x1af   : > { %1123 = vmatpush3.xpose.msk.msra.mxu0 %vm300_vm2, %v634_v19  ;;  %1124 = vmatprep.mubr.msk.f32.mxu0 %vm1378_vm1, %v1377_v0 }
 0x1b0   : > { %1132 = vmatprep.subr.mxu0 %v1377_v0 }
 0x1b2   : > { %1125 = vmatmul.mubr.msk.f32.vlgmr.msra.gmra.mrb[4].mxu0 %vm300_vm2, %v632_v20  ;;  %v796_v22 = vpop.permute.xlu0 %795 }
 0x1b3   : > { %1133 = vmatpush3.xpose.msk.msra.mxu0 %vm300_vm2, %v798_v21  ;;  %1134 = vmatprep.mubr.msk.f32.mxu0 %vm1378_vm1, %v1377_v0 }
 0x1b6   : > { %1135 = vmatmul.mubr.msk.f32.vlgmr.msra.gmra.mrb[6].mxu0 %vm300_vm2, %v796_v22 }
 0x27d   : > { %v371_v26 = vpop.f32.mrb[0].mxu1 }
 0x27e   : > { %v375_v27 = vmul.f32 0.17677669, %v371_v26  ;;  %v1106_v28 = vpop.f32.mrb[1].mxu1 }
 0x280   : > { %v376_v29 = vsel %vm289_vm3, %v375_v27, -inf }
 0x281   : > { %v377_v30 = vmul.f32 1.442695, %v376_v29  ;;  %v538_v31 = vpop.f32.mrb[2].mxu0 }
 0x282   : > { %v542_v32 = vmul.f32 0.17677669, %v538_v31  ;;  %v1116_v33 = vpop.f32.mrb[3].mxu0 }
 0x283   : > { %1227 = vpow2.f32 %v377_v30 }
 0x284   : > { %v543_v34 = vsel %vm289_vm3, %v542_v32, -inf }
 0x285   : > { %v544_v35 = vmul.f32 1.442695, %v543_v34  ;;  %v705_v36 = vpop.f32.mrb[4].mxu0 }
 0x286   : > { %v709_v37 = vmul.f32 0.17677669, %v705_v36  ;;  %v1126_v38 = vpop.f32.mrb[5].mxu0 }
 0x287   : > { %1229 = vpow2.f32 %v544_v35 }
 0x288   : > { %v710_v39 = vsel %vm289_vm3, %v709_v37, -inf }
 0x289   : > { %v711_v40 = vmul.f32 1.442695, %v710_v39  ;;  %v869_v41 = vpop.f32.mrb[6].mxu0 }
 0x28a   : > { %v1136_v42 = vpop.f32.mrb[7].mxu0  ;;  %v873_v49 = vmul.f32 0.17677669, %v869_v41 }
 0x28b   : > { %1231 = vpow2.f32 %v711_v40 }
 0x28c   : > { %v874_v50 = vsel %vm289_vm3, %v873_v49, -inf }
 0x28d   : > { %v1228_v43 = vpop.eup %1227  ;;  %v875_v51 = vmul.f32 1.442695, %v874_v50 }
 0x28e   : > { %v379_v44 = vsel %vm300_vm2, %v1228_v43, 0.0 }
 0x28f   : > { %380 = vadd.xlane.f32.xlu1 %v379_v44  ;;  %1233 = vpow2.f32 %v875_v51 }
 0x291   : > { %v1230_v45 = vpop.eup %1229 }
 0x292   : > { %v546_v46 = vsel %vm300_vm2, %v1230_v45, 0.0 }
 0x293   : > { %547 = vadd.xlane.f32.xlu0 %v546_v46 }
 0x295   : > { %v1232_v47 = vpop.eup %1231 }
 0x296   : > { %v713_v48 = vsel %vm300_vm2, %v1232_v47, 0.0 }
 0x297   : > { %714 = vadd.xlane.f32.xlu0 %v713_v48 }
 0x299   : > { %v1234_v52 = vpop.eup %1233 }
 0x29a   : > { %v877_v53 = vsel %vm300_vm2, %v1234_v52, 0.0 }
 0x2a0   : > { %554 = vrot.lane.b32.xlu1 %v1567_v14, %s1386_s9 }
 0x2ad   : > { %387 = vrot.lane.b32.xlu0 %v1567_v14, %s1387_s10 }
 0x2c4   : > { %878 = vadd.xlane.f32.xlu1 %v877_v53 }
 0x2d5   : > { %886 = vrot.lane.b32.xlu1 %v1572_v15, %s1380_s20  ;;  %s965_s20 = scalar_lea.sflag [#allocation4], %s1545_s30 }
 0x31c   : > { %v381_v54 = vpop.xlane.xlu1 %380 }
 0x31d   : > { %1235 = vrcp.f32 %v381_v54 }
 0x320   : > { %v548_v55 = vpop.xlane.xlu0 %547  ;;  %v555_v4 = vpop.permute.xlu1 %554 }
 0x321   : > { %1237 = vrcp.f32 %v548_v55 }
 0x324   : > { %v715_v56 = vpop.xlane.xlu0 %714 }
 0x325   : > { %1239 = vrcp.f32 %v715_v56 }
 0x327   : > { %v1236_v57 = vpop.eup %1235 }
 0x328   : > { %v383_v58 = vmul.f32 %v1236_v57, %v381_v54  ;;  %v388_v59 = vpop.permute.xlu0 %387 }
 0x329   : > { %1108 = vmatpush3.msra.mxu1 %v388_v59 }
 0x32a   : > { %v384_v60 = vsub.f32 2.0, %v383_v58  ;;  %1117 = vmatprep.subr.mxu1 %v1377_v0 }
 0x32b   : > { %v1238_v61 = vpop.eup %1237 }
 0x32c   : > { %v385_v62 = vmul.f32 %v1236_v57, %v384_v60  ;;  %v550_v63 = vmul.f32 %v1238_v61, %v548_v55 }
 0x32e   : > { %v386_v1 = vmul.f32 %v1228_v43, %v385_v62  ;;  %v551_v2 = vsub.f32 2.0, %v550_v63 }
 0x32f   : > { %v1240_v3 = vpop.eup %1239 }
 0x330   : > { %1110 = vmatmul.mubr.msk.f32.vlgmr.msra.gmra.mrb[2].mxu1 %vm300_vm2, %v386_v1  ;;  %v552_v5 = vmul.f32 %v1238_v61, %v551_v2  ;;  %v717_v6 = vmul.f32 %v1240_v3, %v715_v56 }
 0x331   : > { %1118 = vmatpush3.msra.mxu1 %v555_v4  ;;  %1119 = vmatprep.mubr.msk.f32.mxu1 %vm1378_vm1, %v1377_v0 }
 0x332   : > { %1127 = vmatprep.subr.mxu1 %v1377_v0  ;;  %v553_v7 = vmul.f32 %v1230_v45, %v552_v5  ;;  %v718_v8 = vsub.f32 2.0, %v717_v6 }
 0x334   : > { %v719_v9 = vmul.f32 %v1240_v3, %v718_v8 }
 0x336   : > { %v720_v10 = vmul.f32 %v1232_v47, %v719_v9 }
 0x338   : > { %1120 = vmatmul.mubr.msk.f32.vlgmr.msra.gmra.mrb[2].mxu1 %vm300_vm2, %v553_v7 }
 0x339   : > { %1128 = vmatpush3.msra.mxu1 %v1572_v15  ;;  %1129 = vmatprep.mubr.msk.f32.mxu1 %vm1378_vm1, %v1377_v0 }
 0x33a   : > { %1137 = vmatprep.subr.mxu1 %v1377_v0 }
 0x340   : > { %1130 = vmatmul.mubr.msk.f32.vlgmr.msra.gmra.mrb[2].mxu1 %vm300_vm2, %v720_v10 }
 0x341   : > { %1139 = vmatprep.mubr.msk.f32.mxu1 %vm1378_vm1, %v1377_v0 }
 0x351   : > { %v879_v11 = vpop.xlane.xlu1 %878 }
 0x352   : > { %1241 = vrcp.f32 %v879_v11 }
 0x355   : > { %v887_v12 = vpop.permute.xlu1 %886 }
 0x356   : > { %1138 = vmatpush3.msra.mxu1 %v887_v12 }
 0x35c   : > { %v1242_v13 = vpop.eup %1241 }
 0x35d   : > { %v881_v14 = vmul.f32 %v1242_v13, %v879_v11 }
 0x35f   : > { %v882_v15 = vsub.f32 2.0, %v881_v14 }
 0x361   : > { %v883_v16 = vmul.f32 %v1242_v13, %v882_v15 }
 0x363   : > { %v884_v17 = vmul.f32 %v1234_v52, %v883_v16 }
 0x365   : > { %1140 = vmatmul.mubr.msk.f32.vlgmr.msra.gmra.mrb[2].mxu1 %vm300_vm2, %v884_v17 }
 0x438   : > { %v958_v0 = vpop.f32.mrb[2].mxu1 }
 0x439   : > { %v1150_v19 = vadd.f32 %v1069_v18, %v958_v0  ;;  %v1141_v20 = vpop.f32.mrb[3].mxu1 }
 0x43b   : > { %963 = vst.msk [vmem:[%s200_s29] sm:$0xff] %vm210_vm0, %v1150_v19 }
 0x43c   : > { %1314 = shalt.err (!%p1311_p7)
}
 0x43d   : > { %s1315_s30 = scalar_lea.hbm %s1632_s18, 128  ;;  %s1319_s8 = scalar_lea.hbm %s1680_s3, 256 }
 0x43e   : > { %p1316_p9 = scmp.ne.s32.totalorder %s1632_s18, %s1315_s30  ;;  %p1320_p0 = scmp.lt.u32.totalorder %s1632_s18, %s1680_s3 }
 0x43f   : > { %p1321_p11 = scmp.lt.u32.totalorder %s1319_s8, %s1315_s30  ;;  %p1323_p4 = scmp.lt.u32.totalorder %s1315_s30, %s1632_s18 }
 0x440   : > { %p1317_p2 = pnand %p1316_p9, %p1500_p12 }
 0x441   : > { %p1322_p1 = por %p1321_p11, %p1320_p0 }
 0x442   : > { %p1318_p5 = pneg %p1317_p2 }
 0x443   : > { %p1324_p6 = por %p1323_p4, %p1322_p1 }
 0x445   : > { %p1325_p8 = pnand %p1324_p6, %p1318_p5 }
 0x447   : > { %1328 = shalt.err (!%p1325_p8)
}
 0x448   : > { %1163 = dma.vmem_to_hbm [thread:$0]  (%p1500_p12), %s1634_s23, 128, %s1632_s18, %s965_s20  }
 0x449 PF: > { %s990_s11 = sand.u32 1, %s1359_s12   ;;  %p1695_p10 = scmp.ne.s32.totalorder %s1685_s19, 0 }
 0x44a   : > { %p1696_p13 = scmp.ge.s32.totalorder %s1371_s15, 2  ;;  %s991_s27 = scalar_lea.sflag [#allocation4], %s990_s11 }
 0x44c   : > { %p1174_p3 = pnand %p1696_p13, %p1695_p10 }
 0x44e   : > { %1354 = dma.done.wait (!%p1174_p3), %s991_s27, 128  }
 0x44f   : > { %1356 = vsyncadd (!%p1174_p3), %s991_s27, 4294967168  ;;  %p17_p7 = scmp.ge.s32.totalorder %s1465_s24, 4   ;;  %s1697_s12 = smov %s1363_s13 }
 0x450   : > { %s1698_s13 = smov %s1367_s14  ;;  %s1699_s14 = smov %s1496_s17 }
 0x451   : > { %s1700_s15 = smov %s1465_s24  ;;  %19 = sbr.rel (!%p17_p7) target bundleno = 6 (0x6), region = 81 }
 0x458   :  { %996 = vsyncpa [#allocation3], 1 }
 0x459   :  { %998 = vsyncpa [#allocation3 + $0x1], 1 }
 0x45a   :  { %999 = vsyncpa [#allocation6], 1 }
 0x45b   :  { %1000 = vsyncpa [#allocation4], 1 }
 0x45c   :  { %1002 = vsyncpa [#allocation4 + $0x1], 1 }

</bundles_post_ra>
